<compile_context>
chip_gen: v5e
topology: v5e:2x2
jax: 0.10.0
libtpu: 0.0.40
codegen_flags: <defaults>
</compile_context>

<pallas_src>
import math

import jax
import jax.numpy as jnp
from jax import lax
from jax.experimental import pallas as pl
from jax.experimental.pallas import tpu as pltpu


def _siglip_softplus_sum_kernel(temp_ref, bias_ref, audio_ref, text_ref, out_ref, acc_ref):
    """Grid = (layer l, audio tile i, text tile j); j innermost (reduction axis).

    Emits one scalar per (l, i): sum_{p,q} softplus(temp_l * <a_p, t_q> + bias_l)
    over that row of text tiles.  Diagonal / padding corrections happen in the wrapper.
    """
    l = pl.program_id(0)
    j = pl.program_id(2)
    nj = pl.num_programs(2)

    @pl.when(j == 0)
    def _():
        acc_ref[...] = jnp.zeros_like(acc_ref)

    a = audio_ref[0]  # (tile, D), native dtype (bf16 or f32); resident across the j row
    t = text_ref[0]   # (tile, D), streams along j

    # sims[p, q] = <a_p, t_q>: contract over D (the lane axis) of both operands so no
    # transpose is needed before the MXU push; accumulate in f32.
    sims = lax.dot_general(
        a, t,
        dimension_numbers=(((1,), (1,)), ((), ())),
        preferred_element_type=jnp.float32,
    )
    sims = sims * temp_ref[l] + bias_ref[l]  # temp is already exp()'d in the wrapper

    # Stable softplus(x) = max(x, 0) + log1p(exp(-|x|)) == -logsigmoid(-x).
    sp = jnp.maximum(sims, 0.0) + jnp.log1p(jnp.exp(-jnp.abs(sims)))

    # Lane (XLU) reduce straight into a (tile, 1) accumulator: no (T, T) RMW per step.
    acc_ref[...] += jnp.sum(sp, axis=1, keepdims=True)

    # One tiny reduce + scalar store per (l, i) row, not per tile.
    @pl.when(j == nj - 1)
    def _():
        out_ref[0, 0] = jnp.sum(acc_ref[...])


_GRAN = 16  # tile granularity: multiple of 16 keeps bf16 sublane packing clean (f32 needs 8)


def _round_up(x, m):
    return ((x + m - 1) // m) * m


def _vmem_capacity_bytes():
    try:
        info = pltpu.get_tpu_info()
        cap = getattr(info, "vmem_capacity_bytes", None)
        if cap:
            return int(cap)
    except Exception:
        pass
    return 64 * 1024 * 1024  # conservative fallback (v7x per-TensorCore VMEM)


def _pick_tile(n, d, in_itemsize, vmem_budget_bytes, max_tile=1024):
    """Largest tile (multiple of 16) whose per-step working set fits the VMEM budget."""

    def vmem_needed(t):
        inputs = 2 * 2 * t * d * in_itemsize   # audio + text tiles, double-buffered
        temporaries = 3 * t * t * 4            # f32 sims + softplus temporaries
        acc = t * 128 * 4                      # (tile, 1) f32 accumulator (lane-padded)
        return inputs + temporaries + acc

    tile = min(max_tile, _round_up(n, _GRAN))
    tile = max(_GRAN, (tile // _GRAN) * _GRAN)
    while tile > _GRAN and vmem_needed(tile) > vmem_budget_bytes:
        tile -= _GRAN
    # Keep num_t >= 2 for moderate/large N so the i axis feeds both v7x TensorCores
    # (L is often 1).  Small-N cases (grid of a few steps) stay single-tile: per-step
    # compute there is negligible, so deeper buffering / splitting buys nothing.
    if n >= 256:
        tile = min(tile, _round_up((n + 1) // 2, _GRAN))
    return tile


def sigmoid_contrastive_loss(audio_latents, text_latents, log_temperatures, bias, *, tile=None):
    """Pallas TPU implementation of SigmoidContrastiveLearning.forward (single device)."""
    if audio_latents.ndim == 2:
        audio_latents = audio_latents[None]
    if text_latents.ndim == 2:
        text_latents = text_latents[None]

    L, N, D = audio_latents.shape
    assert text_latents.shape == (L, N, D), (audio_latents.shape, text_latents.shape)

    in_dtype = jnp.promote_types(audio_latents.dtype, text_latents.dtype)
    audio_latents = audio_latents.astype(in_dtype)
    text_latents = text_latents.astype(in_dtype)
    itemsize = jnp.dtype(in_dtype).itemsize

    vmem_cap = _vmem_capacity_bytes()
    if tile is None:
        tile = _pick_tile(N, D, itemsize, vmem_budget_bytes=vmem_cap // 2)
    assert tile % 8 == 0, tile
    num_t = -(-N // tile)
    n_pad = num_t * tile

    # Ragged N: zero-pad.  Padded pairs have dot == 0, so each contributes exactly
    # softplus(bias_l); subtracted analytically below (no in-kernel masking needed).
    if n_pad != N:
        pad = ((0, 0), (0, n_pad - N), (0, 0))
        audio_p = jnp.pad(audio_latents, pad)
        text_p = jnp.pad(text_latents, pad)
    else:
        audio_p, text_p = audio_latents, text_latents

    # Hoist the scalar exp out of the kernel; params stay f32 scalars in SMEM.
    temps = jnp.exp(jnp.asarray(log_temperatures, jnp.float32).reshape(L))
    biases = jnp.asarray(bias, jnp.float32).reshape(L)

    partial = pl.pallas_call(
        _siglip_softplus_sum_kernel,
        out_shape=jax.ShapeDtypeStruct((L, num_t), jnp.float32),
        grid_spec=pltpu.PrefetchScalarGridSpec(
            num_scalar_prefetch=2,  # temps, biases -> SMEM, indexed with program_id(0)
            grid=(L, num_t, num_t),
            in_specs=[
                # audio tile: index_map independent of j -> resident across the whole j row
                pl.BlockSpec((1, tile, D), lambda l, i, j, t_ref, b_ref: (l, i, 0)),
                # text tile: streams along the innermost j (reduction) axis
                pl.BlockSpec((1, tile, D), lambda l, i, j, t_ref, b_ref: (l, j, 0)),
            ],
            out_specs=pl.BlockSpec((1, 1), lambda l, i, j, t_ref, b_ref: (l, i),
                                   memory_space=pltpu.SMEM),      # per-(l, i) partial sum
            scratch_shapes=[pltpu.VMEM((tile, 1), jnp.float32)],   # per-row accumulator
        ),
        compiler_params=pltpu.CompilerParams(
            dimension_semantics=("parallel", "parallel", "arbitrary"),
            vmem_limit_bytes=int(vmem_cap * 0.9),
        ),
    )(temps, biases, audio_p, text_p)

    softplus_sum = jnp.sum(partial)

    # Analytic corrections (once, outside the hot loop):
    #  * padded pairs: sims = bias_l exactly -> softplus(bias_l) each.
    #  * diagonal labels: -logsigmoid(+s) = softplus(s) - s, so subtract
    #      trace_l(sims) = temp_l * sum_i <a_li, t_li> + N * bias_l.
    pad_pairs = jnp.float32(n_pad * n_pad - N * N)
    pad_corr = pad_pairs * jnp.sum(jax.nn.softplus(biases))
    diag_dot = jnp.einsum(
        'lnd,lnd->l',
        audio_latents.astype(jnp.float32), text_latents.astype(jnp.float32))
    trace_sum = jnp.sum(temps * diag_dot + jnp.float32(N) * biases)

    return (softplus_sum - pad_corr - trace_sum) / N


def _reference_loss(audio_latents, text_latents, log_temperatures, bias):
    """Pure-JAX reference mirroring the PyTorch forward (single device)."""
    if audio_latents.ndim == 2:
        audio_latents = audio_latents[None]
    if text_latents.ndim == 2:
        text_latents = text_latents[None]
    L = audio_latents.shape[0]
    n = text_latents.shape[1]
    sims = jnp.einsum('lid,ljd->lij', audio_latents, text_latents,
                      precision=lax.Precision.HIGHEST)
    sims = (sims * jnp.exp(jnp.asarray(log_temperatures, jnp.float32).reshape(L, 1, 1))
            + jnp.asarray(bias, jnp.float32).reshape(L, 1, 1))
    labels = 2.0 * jnp.eye(n, dtype=sims.dtype)[None] - jnp.ones_like(sims)
    return -jnp.sum(jax.nn.log_sigmoid(labels * sims)) / n


if __name__ == "__main__":
    key = jax.random.PRNGKey(0)
    k_a1, k_t1, k_a2, k_t2, k_a3, k_t3 = jax.random.split(key, 6)

    # --- Test 1: module defaults (layers=1, init_temp=10, init_bias=-10), small f32,
    #     2-D inputs to exercise the ndim==2 -> (1, n, d) promotion; single (padded) tile. ---
    log_t1 = jnp.full((1, 1, 1), math.log(10.0), dtype=jnp.float32)
    bias1 = jnp.full((1, 1, 1), -10.0, dtype=jnp.float32)
    audio1 = jax.random.normal(k_a1, (8, 32), dtype=jnp.float32)
    text1 = jax.random.normal(k_t1, (8, 32), dtype=jnp.float32)
    loss1 = jax.block_until_ready(sigmoid_contrastive_loss(audio1, text1, log_t1, bias1))
    ref1 = jax.block_until_ready(_reference_loss(audio1, text1, log_t1, bias1))
    assert jnp.allclose(loss1, ref1, rtol=2e-3, atol=1e-2), (loss1, ref1)

    # --- Test 2: multi-layer bf16 inputs; auto tile picker gives tile=128, num_t=2 for
    #     N=256 (exercises tiling, audio residency across j, and both-TC-friendly grid). ---
    log_t2 = jnp.stack([jnp.full((1, 1), math.log(10.0)),
                        jnp.full((1, 1), math.log(5.0))]).astype(jnp.float32)
    bias2 = jnp.stack([jnp.full((1, 1), -10.0),
                       jnp.full((1, 1), -5.0)]).astype(jnp.float32)
    audio2 = jax.random.normal(k_a2, (2, 256, 64), dtype=jnp.bfloat16)
    text2 = jax.random.normal(k_t2, (2, 256, 64), dtype=jnp.bfloat16)
    loss2 = jax.block_until_ready(sigmoid_contrastive_loss(audio2, text2, log_t2, bias2))
    ref2 = jax.block_until_ready(_reference_loss(audio2.astype(jnp.float32),
                                                 text2.astype(jnp.float32), log_t2, bias2))
    assert jnp.allclose(loss2, ref2, rtol=2e-3, atol=2e-2), (loss2, ref2)

    # --- Test 3: ragged N (not a tile multiple) -> zero-padding + analytic pad correction. ---
    log_t3 = jnp.full((1, 1, 1), math.log(10.0), dtype=jnp.float32)
    bias3 = jnp.full((1, 1, 1), -10.0, dtype=jnp.float32)
    audio3 = jax.random.normal(k_a3, (1, 200, 48), dtype=jnp.float32)
    text3 = jax.random.normal(k_t3, (1, 200, 48), dtype=jnp.float32)
    loss3 = jax.block_until_ready(sigmoid_contrastive_loss(audio3, text3, log_t3, bias3))
    ref3 = jax.block_until_ready(_reference_loss(audio3, text3, log_t3, bias3))
    assert jnp.allclose(loss3, ref3, rtol=2e-3, atol=2e-2), (loss3, ref3)

    print("KERNEL_OK")
</pallas_src>

<mosaic_0001>
module attributes {stable_mosaic.version = 11 : i64} {
  func.func @_siglip_softplus_sum_kernel(%arg0: i32, %arg1: i32, %arg2: i32, %arg3: memref<1xf32, #tpu.memory_space<smem>>, %arg4: memref<1xf32, #tpu.memory_space<smem>>, %arg5: memref<1x16x32xf32, #tpu.memory_space<vmem>>, %arg6: memref<1x16x32xf32, #tpu.memory_space<vmem>>, %arg7: memref<1x1xf32, #tpu.memory_space<smem>>, %arg8: memref<16x1xf32, #tpu.memory_space<vmem>>) attributes {dimension_semantics = [#tpu.dimension_semantics<parallel>, #tpu.dimension_semantics<parallel>, #tpu.dimension_semantics<arbitrary>], iteration_bounds = array<i64: 1, 1, 1>, scalar_prefetch = 2 : i64, scratch_operands = 1 : i64, tpu.core_type = #tpu.core_type<tc>, window_params = [{transform_indices = @transform_0, window_bounds = array<i64: 1, 16, 32>}, {transform_indices = @transform_1, window_bounds = array<i64: 1, 16, 32>}, {transform_indices = @transform_2, window_bounds = array<i64: 1, 1>}]} {
    %c0_i32 = arith.constant 0 : i32
    %0 = arith.cmpi eq, %arg2, %c0_i32 : i32
    %1 = arith.extui %0 : i1 to i32
    %c0_i32_0 = arith.constant 0 : i32
    %2 = arith.cmpi ne, %1, %c0_i32_0 : i32
    scf.if %2 {
      %cst_15 = arith.constant 0.000000e+00 : f32
      %32 = vector.broadcast %cst_15 : f32 to vector<16x1xf32>
      %c0_16 = arith.constant 0 : index
      %c0_17 = arith.constant 0 : index
      %33 = vector.load %arg8[%c0_16, %c0_17] : memref<16x1xf32, #tpu.memory_space<vmem>>, vector<16x1xf32>
      tpu.vector_store %arg8[%c0_16, %c0_17], %32 {strides = array<i32>} : memref<16x1xf32, #tpu.memory_space<vmem>>, vector<16x1xf32>,
    } else {
    }
    %c0 = arith.constant 0 : index
    %c0_1 = arith.constant 0 : index
    %c0_2 = arith.constant 0 : index
    %3 = vector.load %arg5[%c0, %c0_1, %c0_2] : memref<1x16x32xf32, #tpu.memory_space<vmem>>, vector<1x16x32xf32>
    %4 = vector.shape_cast %3 : vector<1x16x32xf32> to vector<16x32xf32>
    %c0_3 = arith.constant 0 : index
    %c0_4 = arith.constant 0 : index
    %c0_5 = arith.constant 0 : index
    %5 = vector.load %arg6[%c0_3, %c0_4, %c0_5] : memref<1x16x32xf32, #tpu.memory_space<vmem>>, vector<1x16x32xf32>
    %6 = vector.shape_cast %5 : vector<1x16x32xf32> to vector<16x32xf32>
    %cst = arith.constant dense<0.000000e+00> : vector<16x16xf32>
    %7 = tpu.matmul %4, %6, %cst {dimension_numbers = #tpu.dot_dimension_numbers<[1], [1], [0], [0], [0, 0, 1, 0], [], []>} : vector<16x32xf32>, vector<16x32xf32>, vector<16x16xf32> -> vector<16x16xf32>
    %8 = arith.index_cast %arg0 : i32 to index
    %9 = memref.load %arg3[%8] : memref<1xf32, #tpu.memory_space<smem>>
    %10 = vector.broadcast %9 : f32 to vector<16x16xf32>
    %11 = arith.mulf %7, %10 : vector<16x16xf32>
    %12 = arith.index_cast %arg0 : i32 to index
    %13 = memref.load %arg4[%12] : memref<1xf32, #tpu.memory_space<smem>>
    %14 = vector.broadcast %13 : f32 to vector<16x16xf32>
    %15 = arith.addf %11, %14 : vector<16x16xf32>
    %cst_6 = arith.constant 0.000000e+00 : f32
    %16 = vector.broadcast %cst_6 : f32 to vector<16x16xf32>
    %17 = arith.maximumf %15, %16 : vector<16x16xf32>
    %18 = math.absf %15 : vector<16x16xf32>
    %cst_7 = arith.constant 0.000000e+00 : f32
    %19 = vector.broadcast %cst_7 : f32 to vector<16x16xf32>
    %20 = arith.subf %19, %18 : vector<16x16xf32>
    %21 = math.exp %20 : vector<16x16xf32>
    %22 = math.log1p %21 : vector<16x16xf32>
    %23 = arith.addf %17, %22 : vector<16x16xf32>
    %c0_8 = arith.constant 0 : index
    %c0_9 = arith.constant 0 : index
    %24 = vector.load %arg8[%c0_8, %c0_9] : memref<16x1xf32, #tpu.memory_space<vmem>>, vector<16x1xf32>
    %cst_10 = arith.constant dense<0.000000e+00> : vector<16xf32>
    %25 = vector.multi_reduction <add>, %23, %cst_10 [1] : vector<16x16xf32> to vector<16xf32>
    %26 = vector.shape_cast %25 : vector<16xf32> to vector<16x1xf32>
    %27 = arith.addf %24, %26 : vector<16x1xf32>
    %c0_11 = arith.constant 0 : index
    %c0_12 = arith.constant 0 : index
    %28 = vector.load %arg8[%c0_11, %c0_12] : memref<16x1xf32, #tpu.memory_space<vmem>>, vector<16x1xf32>
    tpu.vector_store %arg8[%c0_11, %c0_12], %27 {strides = array<i32>} : memref<16x1xf32, #tpu.memory_space<vmem>>, vector<16x1xf32>,
    %c0_i32_13 = arith.constant 0 : i32
    %29 = arith.cmpi eq, %arg2, %c0_i32_13 : i32
    %30 = arith.extui %29 : i1 to i32
    %c0_i32_14 = arith.constant 0 : i32
    %31 = arith.cmpi ne, %30, %c0_i32_14 : i32
    scf.if %31 {
      %c0_15 = arith.constant 0 : index
      %c0_16 = arith.constant 0 : index
      %32 = vector.load %arg8[%c0_15, %c0_16] : memref<16x1xf32, #tpu.memory_space<vmem>>, vector<16x1xf32>
      %33 = vector.shape_cast %32 : vector<16x1xf32> to vector<1x16x1xf32>
      %cst_17 = arith.constant dense<0.000000e+00> : vector<1xf32>
      %34 = vector.multi_reduction <add>, %33, %cst_17 [1, 2] : vector<1x16x1xf32> to vector<1xf32>
      %35 = vector.shape_cast %34 : vector<1xf32> to vector<1x1x1xf32>
      %36 = vector.extract %35[0, 0, 0] : f32 from vector<1x1x1xf32>
      %c0_18 = arith.constant 0 : index
      %c0_19 = arith.constant 0 : index
      %37 = memref.load %arg7[%c0_18, %c0_19] : memref<1x1xf32, #tpu.memory_space<smem>>
      memref.store %36, %arg7[%c0_18, %c0_19] : memref<1x1xf32, #tpu.memory_space<smem>>
    } else {
    }
    return
  }
  func.func @transform_0(%arg0: i32, %arg1: i32, %arg2: i32, %arg3: memref<1xf32, #tpu.memory_space<smem>>, %arg4: memref<1xf32, #tpu.memory_space<smem>>) -> (i32, i32, i32) {
    %c0_i32 = arith.constant 0 : i32
    %c0_i32_0 = arith.constant 0 : i32
    return %arg0, %arg1, %c0_i32 : i32, i32, i32
  }
  func.func @transform_1(%arg0: i32, %arg1: i32, %arg2: i32, %arg3: memref<1xf32, #tpu.memory_space<smem>>, %arg4: memref<1xf32, #tpu.memory_space<smem>>) -> (i32, i32, i32) {
    %c0_i32 = arith.constant 0 : i32
    %c0_i32_0 = arith.constant 0 : i32
    return %arg0, %arg2, %c0_i32 : i32, i32, i32
  }
  func.func @transform_2(%arg0: i32, %arg1: i32, %arg2: i32, %arg3: memref<1xf32, #tpu.memory_space<smem>>, %arg4: memref<1xf32, #tpu.memory_space<smem>>) -> (i32, i32) {
    %c0_i32 = arith.constant 0 : i32
    return %arg0, %arg1 : i32, i32
  }
}

</mosaic_0001>

<bundles_post_ra>
// kernel: tpu_custom_call.1
= control target key start
LH: loop header
LB: loop body
LE: loop exit
PB: predicated region body
PF: predicated region fallthrough
CT: control target
= control target key end

     0   :  { %11 = vsyncpa [#allocation7], 0  ;;  %s323_s0 = inlined_call_operand.<no memory space> [shape: f32[1], index: 0, kind: input, shape index: {}]   ;;  %s324_s1 = inlined_call_operand.<no memory space> [shape: f32[1], index: 1, kind: input, shape index: {}]   ;;  %s325_s2 = inlined_call_operand.hbm [shape: f32[1,16,32], index: 2, kind: input, shape index: {}]   ;;  %s326_s3 = inlined_call_operand.hbm [shape: f32[1,16,32], index: 3, kind: input, shape index: {}]   ;;  %s327_s4 = inlined_call_operand.hbm [shape: f32[1,1], index: 4, kind: output, shape index: {}]  }
   0x1   :  { %12 = vsyncpa [#allocation10], 0 }
   0x2   :  { %13 = vsyncpa [#allocation8], 0  ;;  %s18_s17 = sshll.u32 %s325_s2, 4  ;;  %s271_s18 = smov [#allocation6]   ;;  %s19_s17 = int_to_ptr.hbm [resolvable:$true] %s18_s17 }
   0x3   :  { %s20_s19 = sshll.u32 %s271_s18, 4  ;;  %s31_s22 = sshll.u32 %s326_s3, 4  ;;  %s21_s19 = int_to_ptr.vmem [resolvable:$true] %s20_s19  ;;  %s32_s22 = int_to_ptr.hbm [resolvable:$true] %s31_s22 }
   0x4   :  { %s272_s23 = smov 128   ;;  %s273_s24 = smov 8  }
   0x5   :  { %26 = dma.hbm_to_vmem [thread:$0]  %s19_s17, 256, %s21_s19, [#allocation7], %s272_s23, %s272_s23, %s273_s24  }
   0x6   :  { %s274_s25 = smov [#allocation9]  }
   0x7   :  { %s33_s26 = sshll.u32 %s274_s25, 4  ;;  %s34_s26 = int_to_ptr.vmem [resolvable:$true] %s33_s26 }
   0x8   :  { %39 = dma.hbm_to_vmem [thread:$0]  %s32_s22, 256, %s34_s26, [#allocation10], %s272_s23, %s272_s23, %s273_s24  }
   0x9   :  { %265 = dma.done.wait [#allocation7], 256  }
   0xa   :  { %266 = vsyncadd [#allocation7], 4294967040 }
   0xb   :  { %267 = dma.done.wait [#allocation10], 256  }
   0xc   :  { %268 = vsyncadd [#allocation10], 4294967040  ;;  %vm59_vm0 = vcmask 261120   ;;  %v58_v0 = vld [vmem:[#allocation9 + $0x8] sm:$0xff]  ;;  %v57_v1 = vld [vmem:[#allocation9] sm:$0xff]  ;;  %v96_v4 = vstv %s323_s0  ;;  %v100_v6 = vstv %s324_s1  ;;  %vm52_vm1 = vcmask 7168  }
   0xd   :  { %183 = vmatpush.xpose.msk.msra.mxu0 %vm59_vm0, %v58_v0  ;;  %187 = vmatpush.xpose.msk.msra.mxu1 %vm59_vm0, %v58_v0  ;;  %v55_v2 = vld [vmem:[#allocation6] sm:$0xff]  ;;  %v56_v3 = vld [vmem:[#allocation6 + $0x8] sm:$0xff]  ;;  %v275_v18 = vmov 0.0   ;;  %vm135_vm3 = vcmask 130048   ;;  %s171_s29 = sshll.u32 %s327_s4, 4  ;;  %s276_s5 = smov [#allocation11]   ;;  %s172_s29 = int_to_ptr.hbm [resolvable:$true] %s171_s29 }
   0xe   :  { %53 = vst.msk [vmem:[#allocation2] sm:$0xff] %vm52_vm1, %v275_v18 }
   0xf   :  { %54 = vst.msk [vmem:[#allocation2 + $0x8] sm:$0xff] %vm52_vm1, %v275_v18 }
  0x11   :  { %184 = vmatpush.xpose.msk.msra.mxu0 %vm59_vm0, %v57_v1  ;;  %188 = vmatpush.xpose.msk.msra.mxu1 %vm59_vm0, %v57_v1 }
  0x14   :  { %185 = vmatmul.msk.f32.vlgmr.msra.gmra.mxu0 %vm59_vm0, %v55_v2  ;;  %186 = vmatmul.msk.f32.vlgmr.msra.gmra.mxu1 %vm59_vm0, %v56_v3 }
  0x15   :  { %v133_v43 = vld [vmem:[#allocation2] sm:$0xff] }
  0x16   :  { %v134_v46 = vld [vmem:[#allocation2 + $0x8] sm:$0xff] }
  0x91   :  { %v89_v5 = vpop.f32.mrf.mxu0  ;;  %v92_v7 = vpop.f32.mrf.mxu1 }
  0x92   :  { %v97_v8 = vmul.f32 %v96_v4, %v89_v5  ;;  %v98_v9 = vmul.f32 %v96_v4, %v92_v7 }
  0x94   :  { %v101_v10 = vadd.f32 %v100_v6, %v97_v8  ;;  %v102_v11 = vadd.f32 %v100_v6, %v98_v9 }
  0x96   :  { %v105_v12 = vand.u32 2147483647, %v101_v10  ;;  %v106_v13 = vand.u32 2147483647, %v102_v11  ;;  %v103_v33 = vmax.f32 %v101_v10, 0.0  ;;  %v104_v40 = vmax.f32 %v102_v11, 0.0 }
  0x98   :  { %v107_v14 = vsub.f32 0.0, %v105_v12  ;;  %v108_v15 = vsub.f32 0.0, %v106_v13 }
  0x9a   :  { %v109_v16 = vmul.f32 1.442695, %v107_v14  ;;  %v111_v17 = vmul.f32 1.442695, %v108_v15 }
  0x9c   :  { %197 = vpow2.f32 %v109_v16 }
  0x9d   :  { %199 = vpow2.f32 %v111_v17 }
  0xa2   :  { %v198_v19 = vpop.eup %197 }
  0xa3   :  { %v200_v20 = vpop.eup %199  ;;  %v113_v21 = vadd.f32 1.0, %v198_v19  ;;  %v116_v22 = vmul.f32 -0.5, %v198_v19  ;;  %v119_v26 = vand.u32 2147483647, %v198_v19 }
  0xa4   :  { %v122_v23 = vadd.f32 1.0, %v200_v20  ;;  %v125_v24 = vmul.f32 -0.5, %v200_v20  ;;  %v128_v29 = vand.u32 2147483647, %v200_v20 }
  0xa5   :  { %201 = vlog2.f32 %v113_v21  ;;  %v117_v25 = vadd.f32 1.0, %v116_v22  ;;  %vm120_vm2 = vcmp.lt.f32.partialorder %v119_v26, 0.0004427343 }
  0xa6   :  { %203 = vlog2.f32 %v122_v23  ;;  %v126_v27 = vadd.f32 1.0, %v125_v24  ;;  %vm129_vm4 = vcmp.lt.f32.partialorder %v128_v29, 0.0004427343 }
  0xa7   :  { %v118_v32 = vmul.f32 %v198_v19, %v117_v25 }
  0xa8   :  { %v127_v36 = vmul.f32 %v200_v20, %v126_v27 }
  0xab   :  { %v202_v28 = vpop.eup %201 }
  0xac   :  { %v204_v30 = vpop.eup %203  ;;  %v115_v31 = vmul.f32 0.6931472, %v202_v28 }
  0xad   :  { %v124_v35 = vmul.f32 0.6931472, %v204_v30 }
  0xae   :  { %v121_v34 = vsel %vm120_vm2, %v118_v32, %v115_v31 }
  0xaf   :  { %v131_v37 = vadd.f32 %v121_v34, %v103_v33  ;;  %v130_v39 = vsel %vm129_vm4, %v127_v36, %v124_v35 }
  0xb0   :  { %v132_v41 = vadd.f32 %v130_v39, %v104_v40 }
  0xb1   :  { %v136_v38 = vsel %vm135_vm3, %v131_v37, 0.0 }
  0xb2   :  { %137 = vadd.xlane.f32.xlu0 %v136_v38  ;;  %v139_v42 = vsel %vm135_vm3, %v132_v41, 0.0 }
  0xba   :  { %140 = vadd.xlane.f32.xlu0 %v139_v42 }
 0x125   :  { %v138_v44 = vpop.xlane.xlu0 %137 }
 0x126   :  { %v142_v45 = vadd.f32 %v138_v44, %v133_v43 }
 0x128   :  { %145 = vst.msk [vmem:[#allocation2] sm:$0xff] %vm52_vm1, %v142_v45 }
 0x12d   :  { %v141_v47 = vpop.xlane.xlu0 %140 }
 0x12e   :  { %v143_v48 = vadd.f32 %v141_v47, %v134_v46 }
 0x12f   :  { %v150_v49 = vld [vmem:[#allocation2] sm:$0xff] }
 0x130   :  { %146 = vst.msk [vmem:[#allocation2 + $0x8] sm:$0xff] %vm52_vm1, %v143_v48  ;;  %v152_v51 = vsel %vm52_vm1, %v150_v49, 0.0 }
 0x137   :  { %v151_v50 = vld [vmem:[#allocation2 + $0x8] sm:$0xff] }
 0x138   :  { %v153_v52 = vsel %vm52_vm1, %v151_v50, 0.0 }
 0x139   :  { %v154_v53 = vadd.f32 %v153_v52, %v152_v51 }
 0x13b   :  { %155 = vadd.xlane.f32.xlu1 %v154_v53 }
 0x1ae   :  { %v156_v54 = vpop.xlane.xlu1 %155 }
 0x1af   :  { %v157_v55 = vrot.slane %v156_v54, 4 }
 0x1b1   :  { %v158_v56 = vadd.f32 %v157_v55, %v156_v54 }
 0x1b3   :  { %v159_v57 = vrot.slane %v158_v56, 2 }
 0x1b5   :  { %v160_v58 = vadd.f32 %v159_v57, %v158_v56 }
 0x1b7   :  { %v161_v59 = vrot.slane %v160_v58, 1 }
 0x1b9   :  { %v162_v60 = vadd.f32 %v161_v59, %v160_v58 }
 0x1bb   :  { %189 = vpush %v162_v60 }
 0x1ec   :  { %s190_s30 = spop %189 }
 0x1ed   :  { %165 = sst [smem:[#allocation11]] %s190_s30 }
 0x1ee   :  { %174 = dma.smem_to_hbm %s276_s5, 16, %s172_s29, [#allocation8]  }
 0x1ef   :  { %269 = dma.done.wait [#allocation8], 16  }
 0x1f0   :  { %270 = vsyncadd [#allocation8], 4294967280 }
 0x1f1   :  { %179 = sfence }
 0x1f2   :  { %180 = vsyncpa [#allocation7], 1 }
 0x1f3   :  { %181 = vsyncpa [#allocation10], 1 }
 0x1f4   :  { %182 = vsyncpa [#allocation8], 1 }

</bundles_post_ra>
